<compile_context>
chip_gen: v7x
topology: tpu7x:2x2x1
jax: 0.10.0
libtpu: 0.0.40
codegen_flags: <defaults>
</compile_context>

<pallas_src>
import functools

import numpy as np
import jax
import jax.numpy as jnp
from jax.experimental import pallas as pl
from jax.experimental.pallas import tpu as pltpu


_LANE = 128                              # full vreg lane width -> unmasked vst
_TARGET_BLOCK_BYTES = 2 * 1024 * 1024    # ~2 MiB/block; 2x(in)+2x(out) buffers
                                         # fit every generation's scoped VMEM


def _identity_kernel(x_ref, o_ref):
    # The "forward pass" of the abstract BaseModel: pass-through.
    o_ref[...] = x_ref[...]


def _sublane_multiple(itemsize: int) -> int:
    # f32 -> 8, bf16 -> 16, int8/fp8 -> 32 (sub-32-bit dtypes pack along sublanes).
    return 8 * max(1, 4 // max(1, itemsize))


def _pick_block_rows(rows_needed: int, itemsize: int) -> int:
    """Largest sublane-aligned block height <= ~2 MiB, preferring >= 2 grid steps."""
    sub = _sublane_multiple(itemsize)
    cap_rows = max(sub, (_TARGET_BLOCK_BYTES // (_LANE * itemsize)) // sub * sub)
    rows_aligned = ((rows_needed + sub - 1) // sub) * sub
    block_rows = min(rows_aligned, cap_rows)
    # v7x megacore: keep at least two "parallel" grid steps when the data allows,
    # so Mosaic can shard the copy across both TensorCores.
    if block_rows == rows_aligned and rows_aligned >= 2 * sub:
        half = ((rows_aligned // 2 + sub - 1) // sub) * sub
        block_rows = max(sub, min(half, block_rows))
    return block_rows


@functools.partial(jax.jit)
def base_model_forward(x: jax.Array) -> jax.Array:
    """Identity forward (BaseModel.forward is abstract). Accepts any shape."""
    orig_shape = x.shape
    total = int(np.prod(orig_shape)) if orig_shape else 1
    if total == 0:
        return x

    itemsize = jnp.dtype(x.dtype).itemsize
    rows_needed = (total + _LANE - 1) // _LANE
    block_rows = _pick_block_rows(rows_needed, itemsize)
    rows = ((rows_needed + block_rows - 1) // block_rows) * block_rows
    padded_total = rows * _LANE

    flat = x.reshape(-1)
    if padded_total != total:
        # Only hit when the element count is not a multiple of 128 lanes.
        flat = jnp.pad(flat, (0, padded_total - total))
    x2d = flat.reshape(rows, _LANE)

    grid = (rows // block_rows,)
    y2d = pl.pallas_call(
        _identity_kernel,
        out_shape=jax.ShapeDtypeStruct((rows, _LANE), x.dtype),
        grid_spec=pltpu.PrefetchScalarGridSpec(
            num_scalar_prefetch=0,
            grid=grid,
            in_specs=[pl.BlockSpec((block_rows, _LANE), lambda i: (i, 0))],
            out_specs=pl.BlockSpec((block_rows, _LANE), lambda i: (i, 0)),
        ),
        # Identity op: alias output onto the input buffer (no second allocation).
        input_output_aliases={0: 0},
        compiler_params=pltpu.CompilerParams(
            dimension_semantics=("parallel",),
        ),
    )(x2d)

    return y2d.reshape(-1)[:total].reshape(orig_shape)


class BaseModelJax:
    """JAX mirror of BaseModel: no parameters, abstract-style forward."""

    def __init__(self, num_classes=None):
        self.num_classes = num_classes
        self.params = {}  # BaseModel.__init__ registers no parameters.

    def num_trainable_parameters(self) -> int:
        return int(sum(np.prod(p.shape) for p in self.params.values()))

    def freeze(self, until: int = -1) -> None:
        # BaseModel.freeze flips requires_grad on child parameters; there are
        # no parameters here, so it only reports the (zero) trainable count.
        print(f"Trainable parameters: {self.num_trainable_parameters()}")

    def __str__(self):
        return (
            f"BaseModelJax(num_classes={self.num_classes})\n"
            f"Trainable parameters: {self.num_trainable_parameters()}"
        )

    def __call__(self, x: jax.Array) -> jax.Array:
        # Concrete subclasses would override this; here it is the identity
        # Pallas kernel standing in for the abstract forward.
        return base_model_forward(x)


if __name__ == "__main__":
    key = jax.random.PRNGKey(0)
    # Small NCHW input consistent with an image-model base class.
    x = jax.random.normal(key, (2, 4, 16, 16), dtype=jnp.float32)

    model = BaseModelJax(num_classes=10)
    y = model(x)
    y = jax.block_until_ready(y)

    # Sanity: identity semantics, shape/dtype preserved, zero parameters.
    assert y.shape == x.shape and y.dtype == x.dtype
    np.testing.assert_allclose(np.asarray(y), np.asarray(x), rtol=0, atol=0)
    assert model.num_trainable_parameters() == 0

    print("KERNEL_OK")
</pallas_src>

<mosaic_0001>
module attributes {stable_mosaic.version = 11 : i64} {
  func.func @_identity_kernel(%arg0: i32, %arg1: memref<8x128xf32, #tpu.memory_space<vmem>>, %arg2: memref<8x128xf32, #tpu.memory_space<vmem>>) attributes {dimension_semantics = [#tpu.dimension_semantics<parallel>], iteration_bounds = array<i64: 2>, scalar_prefetch = 0 : i64, scratch_operands = 0 : i64, tpu.core_type = #tpu.core_type<tc>, window_params = [{transform_indices = @transform_0, window_bounds = array<i64: 8, 128>}, {transform_indices = @transform_1, window_bounds = array<i64: 8, 128>}]} {
    %c0 = arith.constant 0 : index
    %c0_0 = arith.constant 0 : index
    %0 = vector.load %arg1[%c0, %c0_0] : memref<8x128xf32, #tpu.memory_space<vmem>>, vector<8x128xf32>
    %c0_1 = arith.constant 0 : index
    %c0_2 = arith.constant 0 : index
    %1 = vector.load %arg2[%c0_1, %c0_2] : memref<8x128xf32, #tpu.memory_space<vmem>>, vector<8x128xf32>
    tpu.vector_store %arg2[%c0_1, %c0_2], %0 {strides = array<i32>} : memref<8x128xf32, #tpu.memory_space<vmem>>, vector<8x128xf32>,
    return
  }
  func.func @transform_0(%arg0: i32) -> (i32, i32) {
    %c0_i32 = arith.constant 0 : i32
    %c0_i32_0 = arith.constant 0 : i32
    return %arg0, %c0_i32 : i32, i32
  }
  func.func @transform_1(%arg0: i32) -> (i32, i32) {
    %c0_i32 = arith.constant 0 : i32
    %c0_i32_0 = arith.constant 0 : i32
    return %arg0, %c0_i32 : i32, i32
  }
}

</mosaic_0001>

<bundles_post_ra>
// kernel: base_model_forward.1
= control target key start
LH: loop header
LB: loop body
LE: loop exit
PB: predicated region body
PF: predicated region fallthrough
CT: control target
= control target key end

     0   :  { %s188_s6 = smov 0   ;;  %s208_s0 = inlined_call_operand.vmem [shape: f32[16,128], index: 0, kind: input, shape index: {}, may-alias: {0,1}]   ;;  %s209_s1 = inlined_call_operand.vmem [shape: f32[16,128], index: 1, kind: output, shape index: {}, may-alias: {0,1}]  }
   0x1 LB: > { %s167_s7 = sadd.s32 4294967295, %s190_s6   ;;  %p171_p0 = scmp.ge.s32.totalorder %s190_s6, 1  ;;  %s190_s6 = sphi %s188_s6, %s11_s6  }
   0x2   : > { %p86_p1 = scmp.lt.s32.totalorder %s190_s6, 3 }
   0x4   : > { %p87_p2 = pnand %p171_p0, %p86_p1 }
   0x5   : > { %p104_p3 = scmp.lt.s32.totalorder (!%p87_p2), %s167_s7, 1 }
   0x6   : > { %90 = sbr.rel (%p87_p2) target bundleno = 18 (0x12), region = 24 }
   0xd   : > { %s211_s7 = smov (!%p104_p3, %s167_s7), 1 }
   0xe   : > { %s172_s8 = sshll.u32 %s211_s7, 3 }
   0xf   : > { %s107_s11 = scalar_lea.vmem %s208_s0, %s172_s8  ;;  %s111_s14 = scalar_lea.vmem %s209_s1, %s172_s8 }
  0x10   : > { %v112_v0 = vld [vmem:[%s107_s11] sm:$0xff] }
  0x11   : > { %113 = vst [vmem:[%s111_s14] sm:$0xff] %v112_v0 }
  0x12 PF: > { %s11_s6 = sadd.s32 1, %s190_s6  }
  0x13   : > { %p8_p4 = scmp.ge.s32.totalorder %s11_s6, 4  }
  0x15   :  { %10 = sbr.rel (!%p8_p4) target bundleno = 1 (0x1), region = 54 }

</bundles_post_ra>
